<compile_context>
chip_gen: v7x
topology: tpu7x:2x2x1
jax: 0.10.0
libtpu: 0.0.40
codegen_flags: <defaults>
</compile_context>

<pallas_src>
import jax
import jax.numpy as jnp
from jax.experimental import pallas as pl
from jax.experimental.pallas import tpu as pltpu


def _predictor_kernel(x_ref, we_ref, be_ref, wf_ref, bf_ref, o_ref):
    # x_ref : [C_in,  TN]   (N = B*H*W on the lane axis)
    # we_ref: [HID,  C_in]  be_ref: [HID, 1]
    # wf_ref: [C_out, HID]  bf_ref: [C_out, 1]
    # o_ref : [C_out, TN]
    h = jnp.dot(we_ref[...], x_ref[...], preferred_element_type=jnp.float32)
    h = jnp.maximum(h + be_ref[...], 0.0)                       # bias + ReLU
    o = jnp.dot(wf_ref[...], h, preferred_element_type=jnp.float32)
    o_ref[...] = (o + bf_ref[...]).astype(o_ref.dtype)


def predictor_forward(x, w_enc, b_enc, w_fore, b_fore, *,
                      tile_n=8192, interpolate_size=None):
    """Predictor forward.

    x      : [S, B, 1, H, W]            (PyTorch Predictor input convention)
    w_enc  : [HIDDEN, S]    b_enc : [HIDDEN]      (1x1 conv, PyTorch [out,in])
    w_fore : [C_out, HIDDEN] b_fore: [C_out]
    returns: [C_out, B, 1, H', W']
    """
    S, B, one, H, W = x.shape
    assert one == 1, "Predictor expects a singleton channel dim at position 2"
    c_in = S
    hidden = w_enc.shape[0]
    c_out = w_fore.shape[0]
    n = B * H * W

    # squeeze(2) + permute are absorbed into a free contiguous reshape:
    # channels (=S) already lead, the large B*H*W axis lands on lanes.
    x2 = x.reshape(c_in, n)

    # Lane tile: multiple of 128, clamped to (padded) N; zero-pad tail.
    n_pad128 = -(-n // 128) * 128
    tile_n = max(128, min((tile_n // 128) * 128, n_pad128))
    n_pad = -(-n // tile_n) * tile_n
    if n_pad != n:
        x2 = jnp.pad(x2, ((0, 0), (0, n_pad - n)))

    be2 = b_enc.reshape(hidden, 1)
    bf2 = b_fore.reshape(c_out, 1)

    grid = (pl.cdiv(n_pad, tile_n),)

    out2 = pl.pallas_call(
        _predictor_kernel,
        out_shape=jax.ShapeDtypeStruct((c_out, n_pad), x.dtype),
        grid_spec=pltpu.PrefetchScalarGridSpec(
            num_scalar_prefetch=0,
            grid=grid,
            in_specs=[
                pl.BlockSpec((c_in, tile_n), lambda j: (0, j)),    # x slab
                pl.BlockSpec((hidden, c_in), lambda j: (0, 0)),    # encoder W
                pl.BlockSpec((hidden, 1), lambda j: (0, 0)),       # encoder b
                pl.BlockSpec((c_out, hidden), lambda j: (0, 0)),   # forecaster W
                pl.BlockSpec((c_out, 1), lambda j: (0, 0)),        # forecaster b
            ],
            out_specs=pl.BlockSpec((c_out, tile_n), lambda j: (0, j)),
        ),
        compiler_params=pltpu.CompilerParams(
            dimension_semantics=("parallel",),
        ),
    )(x2, w_enc, be2, w_fore, bf2)

    if n_pad != n:
        out2 = out2[:, :n]

    out = out2.reshape(c_out, B, H, W)

    if interpolate_size is not None:
        # TODO(synk): Predictor's optional bilinear Interpolate is done with
        # jax.image.resize (plain JAX), not a Pallas kernel.
        new_h, new_w = interpolate_size
        out = jax.image.resize(out, (c_out, B, new_h, new_w), method="bilinear")
        H, W = new_h, new_w

    # unsqueeze(2) + permute(1,0,2,3,4) is again a free reshape in this layout.
    return out.reshape(c_out, B, 1, H, W)


def _reference(x, w_enc, b_enc, w_fore, b_fore):
    S, B, _, H, W = x.shape
    xi = jnp.transpose(x[:, :, 0], (1, 0, 2, 3))              # [B, S, H, W]
    xr = jnp.transpose(xi, (0, 2, 3, 1)).reshape(-1, S)       # [B*H*W, S]
    h = jnp.maximum(xr @ w_enc.T + b_enc, 0.0)
    o = h @ w_fore.T + b_fore
    o = jnp.transpose(o.reshape(B, H, W, -1), (0, 3, 1, 2))   # [B, C_out, H, W]
    return jnp.transpose(o[:, :, None], (1, 0, 2, 3, 4))      # [C_out, B, 1, H, W]


if __name__ == "__main__":
    # Small deterministic shapes: seq=8, batch=2, spatial=16x16, hidden=32, out=4.
    S, B, H, W = 8, 2, 16, 16
    HIDDEN, C_OUT = 32, 4

    key = jax.random.PRNGKey(0)
    kx, kwe, kbe, kwf, kbf = jax.random.split(key, 5)

    x = jax.random.normal(kx, (S, B, 1, H, W), dtype=jnp.float32)
    w_enc = jax.random.normal(kwe, (HIDDEN, S), dtype=jnp.float32) * 0.1
    b_enc = jax.random.normal(kbe, (HIDDEN,), dtype=jnp.float32) * 0.1
    w_fore = jax.random.normal(kwf, (C_OUT, HIDDEN), dtype=jnp.float32) * 0.1
    b_fore = jax.random.normal(kbf, (C_OUT,), dtype=jnp.float32) * 0.1

    out = predictor_forward(x, w_enc, b_enc, w_fore, b_fore)
    out = jax.block_until_ready(out)

    ref = _reference(x, w_enc, b_enc, w_fore, b_fore)
    assert out.shape == (C_OUT, B, 1, H, W), out.shape
    assert jnp.allclose(out, ref, atol=1e-4, rtol=1e-4), "mismatch vs reference"

    print("KERNEL_OK")
</pallas_src>

<mosaic_0001>
module attributes {stable_mosaic.version = 11 : i64} {
  func.func @_predictor_kernel(%arg0: i32, %arg1: memref<8x512xf32, #tpu.memory_space<vmem>>, %arg2: memref<32x8xf32, #tpu.memory_space<vmem>>, %arg3: memref<32x1xf32, #tpu.memory_space<vmem>>, %arg4: memref<4x32xf32, #tpu.memory_space<vmem>>, %arg5: memref<4x1xf32, #tpu.memory_space<vmem>>, %arg6: memref<4x512xf32, #tpu.memory_space<vmem>>) attributes {dimension_semantics = [#tpu.dimension_semantics<parallel>], iteration_bounds = array<i64: 1>, scalar_prefetch = 0 : i64, scratch_operands = 0 : i64, tpu.core_type = #tpu.core_type<tc>, window_params = [{transform_indices = @transform_0, window_bounds = array<i64: 8, 512>}, {pipeline_mode = #tpu.pipeline_mode<synchronous>, transform_indices = @transform_1, window_bounds = array<i64: 32, 8>}, {pipeline_mode = #tpu.pipeline_mode<synchronous>, transform_indices = @transform_2, window_bounds = array<i64: 32, 1>}, {pipeline_mode = #tpu.pipeline_mode<synchronous>, transform_indices = @transform_3, window_bounds = array<i64: 4, 32>}, {pipeline_mode = #tpu.pipeline_mode<synchronous>, transform_indices = @transform_4, window_bounds = array<i64: 4, 1>}, {transform_indices = @transform_5, window_bounds = array<i64: 4, 512>}]} {
    %c0 = arith.constant 0 : index
    %c0_0 = arith.constant 0 : index
    %0 = vector.load %arg2[%c0, %c0_0] : memref<32x8xf32, #tpu.memory_space<vmem>>, vector<32x8xf32>
    %c0_1 = arith.constant 0 : index
    %c0_2 = arith.constant 0 : index
    %1 = vector.load %arg1[%c0_1, %c0_2] : memref<8x512xf32, #tpu.memory_space<vmem>>, vector<8x512xf32>
    %cst = arith.constant dense<0.000000e+00> : vector<32x512xf32>
    %2 = tpu.matmul %0, %1, %cst {dimension_numbers = #tpu.dot_dimension_numbers<[1], [0], [0], [1], [0, 0, 1, 1], [], []>} : vector<32x8xf32>, vector<8x512xf32>, vector<32x512xf32> -> vector<32x512xf32>
    %c0_3 = arith.constant 0 : index
    %c0_4 = arith.constant 0 : index
    %3 = vector.load %arg3[%c0_3, %c0_4] : memref<32x1xf32, #tpu.memory_space<vmem>>, vector<32x1xf32>
    %4 = vector.broadcast %3 : vector<32x1xf32> to vector<32x512xf32>
    %5 = arith.addf %2, %4 : vector<32x512xf32>
    %cst_5 = arith.constant 0.000000e+00 : f32
    %6 = vector.broadcast %cst_5 : f32 to vector<32x512xf32>
    %7 = arith.maximumf %5, %6 : vector<32x512xf32>
    %c0_6 = arith.constant 0 : index
    %c0_7 = arith.constant 0 : index
    %8 = vector.load %arg4[%c0_6, %c0_7] : memref<4x32xf32, #tpu.memory_space<vmem>>, vector<4x32xf32>
    %cst_8 = arith.constant dense<0.000000e+00> : vector<4x512xf32>
    %9 = tpu.matmul %8, %7, %cst_8 {dimension_numbers = #tpu.dot_dimension_numbers<[1], [0], [0], [1], [0, 0, 1, 1], [], []>} : vector<4x32xf32>, vector<32x512xf32>, vector<4x512xf32> -> vector<4x512xf32>
    %c0_9 = arith.constant 0 : index
    %c0_10 = arith.constant 0 : index
    %10 = vector.load %arg5[%c0_9, %c0_10] : memref<4x1xf32, #tpu.memory_space<vmem>>, vector<4x1xf32>
    %11 = vector.broadcast %10 : vector<4x1xf32> to vector<4x512xf32>
    %12 = arith.addf %9, %11 : vector<4x512xf32>
    %c0_11 = arith.constant 0 : index
    %c0_12 = arith.constant 0 : index
    %13 = vector.load %arg6[%c0_11, %c0_12] : memref<4x512xf32, #tpu.memory_space<vmem>>, vector<4x512xf32>
    tpu.vector_store %arg6[%c0_11, %c0_12], %12 {strides = array<i32>} : memref<4x512xf32, #tpu.memory_space<vmem>>, vector<4x512xf32>,
    return
  }
  func.func @transform_0(%arg0: i32) -> (i32, i32) {
    %c0_i32 = arith.constant 0 : i32
    %c0_i32_0 = arith.constant 0 : i32
    return %c0_i32, %arg0 : i32, i32
  }
  func.func @transform_1(%arg0: i32) -> (i32, i32) {
    %c0_i32 = arith.constant 0 : i32
    %c0_i32_0 = arith.constant 0 : i32
    %c0_i32_1 = arith.constant 0 : i32
    return %c0_i32, %c0_i32_0 : i32, i32
  }
  func.func @transform_2(%arg0: i32) -> (i32, i32) {
    %c0_i32 = arith.constant 0 : i32
    %c0_i32_0 = arith.constant 0 : i32
    %c0_i32_1 = arith.constant 0 : i32
    return %c0_i32, %c0_i32_0 : i32, i32
  }
  func.func @transform_3(%arg0: i32) -> (i32, i32) {
    %c0_i32 = arith.constant 0 : i32
    %c0_i32_0 = arith.constant 0 : i32
    %c0_i32_1 = arith.constant 0 : i32
    return %c0_i32, %c0_i32_0 : i32, i32
  }
  func.func @transform_4(%arg0: i32) -> (i32, i32) {
    %c0_i32 = arith.constant 0 : i32
    %c0_i32_0 = arith.constant 0 : i32
    %c0_i32_1 = arith.constant 0 : i32
    return %c0_i32, %c0_i32_0 : i32, i32
  }
  func.func @transform_5(%arg0: i32) -> (i32, i32) {
    %c0_i32 = arith.constant 0 : i32
    %c0_i32_0 = arith.constant 0 : i32
    return %c0_i32, %arg0 : i32, i32
  }
}

</mosaic_0001>

<bundles_post_ra>
// kernel: tpu_custom_call.1
= control target key start
LH: loop header
LB: loop body
LE: loop exit
PB: predicated region body
PF: predicated region fallthrough
CT: control target
= control target key end

     0   :  { %vm53_vm0 = vcmask 64512   ;;  %v492_v5 = vmov 0.0   ;;  %s587_s0 = inlined_call_operand.vmem [shape: f32[8,512], index: 0, kind: input, shape index: {}]   ;;  %s588_s1 = inlined_call_operand.vmem [shape: f32[32,8], index: 1, kind: input, shape index: {}]   ;;  %s589_s2 = inlined_call_operand.vmem [shape: f32[32,1], index: 2, kind: input, shape index: {}]   ;;  %s590_s3 = inlined_call_operand.vmem [shape: f32[4,32], index: 3, kind: input, shape index: {}]   ;;  %s591_s4 = inlined_call_operand.vmem [shape: f32[4,1], index: 4, kind: input, shape index: {}]   ;;  %s592_s5 = inlined_call_operand.hbm [shape: f32[4,512], index: 5, kind: output, shape index: {}]  }
   0x1   :  { %v26_v0 = vld [vmem:[%s587_s0 + $0x8] sm:$0xff]  ;;  %v28_v1 = vld [vmem:[%s587_s0 + $0x18] sm:$0xff]  ;;  %v25_v2 = vld [vmem:[%s587_s0] sm:$0xff]  ;;  %130 = vmatprep.mubr.f32.mxu0 %v492_v5  ;;  %219 = vmatprep.mubr.f32.mxu1 %v492_v5 }
   0x2   :  { %66 = vmatprep.subr.mxu0 %v26_v0  ;;  %155 = vmatprep.subr.mxu1 %v28_v1  ;;  %v27_v3 = vld [vmem:[%s587_s0 + $0x10] sm:$0xff]  ;;  %v21_v4 = vld [vmem:[%s588_s1] sm:$0xff] }
   0x3   :  { %67 = vmatpush1.msra.mxu0 %v25_v2  ;;  %156 = vmatpush1.msra.mxu1 %v27_v3  ;;  %v29_v6 = vld [vmem:[%s589_s2] sm:$0xff]  ;;  %v31_v7 = vld [vmem:[%s589_s2 + $0x10] sm:$0xff] }
   0x4   :  { %437 = vmatmul.mubr.msk.f32.vlgmr.msra.gmra.mrb[0].mxu0 %vm53_vm0, %v21_v4  ;;  %441 = vmatmul.mubr.msk.f32.vlgmr.msra.gmra.mrb[0].mxu1 %vm53_vm0, %v21_v4 }
   0x5   :  { %10 = vsyncpa [#allocation3], 0  ;;  %136 = vmatprep.mubr.f32.mxu0 %v492_v5  ;;  %225 = vmatprep.mubr.f32.mxu1 %v492_v5  ;;  %v22_v8 = vld [vmem:[%s588_s1 + $0x8] sm:$0xff]  ;;  %v493_v9 = vmov 0   ;;  %v32_v11 = vld [vmem:[%s589_s2 + $0x18] sm:$0xff]  ;;  %vm267_vm1 = vcmask 261120  }
   0x6   :  { %466 = vset.pattern.permute.xlu0 %v493_v9  ;;  %467 = vset.pattern.permute.xlu1 %v493_v9  ;;  %v30_v10 = vld [vmem:[%s589_s2 + $0x8] sm:$0xff]  ;;  %v23_v12 = vld [vmem:[%s588_s1 + $0x10] sm:$0xff]  ;;  %v261_v13 = vld [vmem:[%s591_s4] sm:$0xf]  ;;  %s494_s17 = smov [#allocation2]  }
   0x7   :  { %35 = vperm.xlu0 %466, %v29_v6   ;;  %45 = vperm.xlu1 %467, %v31_v7   ;;  %v24_v14 = vld [vmem:[%s588_s1 + $0x18] sm:$0xff]  ;;  %s429_s18 = sshll.u32 %s494_s17, 4  ;;  %s430_s18 = int_to_ptr.vmem [resolvable:$true] %s429_s18 }
   0x8   :  { %438 = vmatmul.mubr.msk.f32.gmra.mrb[2].mxu0 %vm53_vm0, %v22_v8  ;;  %442 = vmatmul.mubr.msk.f32.gmra.mrb[2].mxu1 %vm53_vm0, %v22_v8  ;;  %p473_p1 = scmp.lt.s32.totalorder %s430_s18, %s430_s18 }
   0x9   :  { %142 = vmatprep.mubr.f32.mxu0 %v492_v5  ;;  %231 = vmatprep.mubr.f32.mxu1 %v492_v5 }
   0xb   :  { %40 = vperm.xlu0 %466, %v30_v10   ;;  %50 = vperm.xlu1 %467, %v32_v11   ;;  %v260_v11 = vld [vmem:[%s590_s3] sm:$0xf]  ;;  %s468_s3 = scalar_lea.vmem %s430_s18, 256 }
   0xc   :  { %439 = vmatmul.mubr.msk.f32.gmra.mrb[4].mxu0 %vm53_vm0, %v23_v12  ;;  %443 = vmatmul.mubr.msk.f32.gmra.mrb[4].mxu1 %vm53_vm0, %v23_v12  ;;  %p469_p0 = scmp.ne.s32.totalorder %s430_s18, %s468_s3  ;;  %p474_p2 = scmp.lt.s32.totalorder %s468_s3, %s468_s3 }
   0xd   :  { %148 = vmatprep.mubr.f32.mxu0 %v492_v5  ;;  %237 = vmatprep.mubr.f32.mxu1 %v492_v5 }
   0xe   :  { %p475_p3 = por %p474_p2, %p473_p1 }
   0xf   :  { %264 = vperm.xlu0 %466, %v261_v13  }
  0x10   :  { %440 = vmatmul.mubr.msk.f32.gmra.mrb[6].mxu0 %vm53_vm0, %v24_v14  ;;  %444 = vmatmul.mubr.msk.f32.gmra.mrb[6].mxu1 %vm53_vm0, %v24_v14  ;;  %p476_p4 = pnand %p475_p3, %p469_p0 }
  0x11   :  { %335 = vmatprep.mubr.f32.mxu0 %v492_v5  ;;  %406 = vmatprep.mubr.f32.mxu1 %v492_v5 }
  0x86   :  { %v36_v15 = vpop.permute.xlu0 %35  ;;  %v46_v23 = vpop.permute.xlu1 %45 }
  0x8a   :  { %v41_v20 = vpop.permute.xlu0 %40  ;;  %v51_v52 = vpop.permute.xlu1 %50 }
  0x8e   :  { %v265_v12 = vpop.permute.xlu0 %264 }
  0xd7   :  { %v132_v16 = vpop.f32.mrb[0].mxu0  ;;  %v221_v17 = vpop.f32.mrb[0].mxu1 }
  0xd8   :  { %v134_v18 = vpop.f32.mrb[1].mxu0  ;;  %v223_v19 = vpop.f32.mrb[1].mxu1  ;;  %v133_v21 = vadd.f32 %v132_v16, %v36_v15  ;;  %v222_v22 = vadd.f32 %v221_v17, %v36_v15 }
  0xd9   :  { %v135_v24 = vadd.f32 %v134_v18, %v36_v15  ;;  %v224_v25 = vadd.f32 %v223_v19, %v36_v15 }
  0xda   :  { %v244_v34 = vmax.f32 %v133_v21, 0.0  ;;  %v246_v35 = vmax.f32 %v222_v22, 0.0 }
  0xdb   :  { %v138_v26 = vpop.f32.mrb[2].mxu0  ;;  %v227_v27 = vpop.f32.mrb[2].mxu1  ;;  %v245_v38 = vmax.f32 %v135_v24, 0.0  ;;  %v247_v39 = vmax.f32 %v224_v25, 0.0 }
  0xdc   :  { %v139_v28 = vadd.f32 %v138_v26, %v41_v20  ;;  %v228_v29 = vadd.f32 %v227_v27, %v41_v20  ;;  %v140_v30 = vpop.f32.mrb[3].mxu0  ;;  %v229_v31 = vpop.f32.mrb[3].mxu1 }
  0xdd   :  { %v141_v32 = vadd.f32 %v140_v30, %v41_v20  ;;  %v230_v33 = vadd.f32 %v229_v31, %v41_v20 }
  0xde   :  { %v248_v36 = vmax.f32 %v139_v28, 0.0  ;;  %v250_v37 = vmax.f32 %v228_v29, 0.0 }
  0xdf   :  { %v249_v40 = vmax.f32 %v141_v32, 0.0  ;;  %v251_v41 = vmax.f32 %v230_v33, 0.0  ;;  %v144_v42 = vpop.f32.mrb[4].mxu0  ;;  %v233_v43 = vpop.f32.mrb[4].mxu1 }
  0xe0   :  { %v449_v44 = vpack.c.bf16 %v248_v36, %v244_v34  ;;  %v457_v45 = vpack.c.bf16 %v250_v37, %v246_v35  ;;  %v146_v46 = vpop.f32.mrb[5].mxu0  ;;  %v235_v47 = vpop.f32.mrb[5].mxu1  ;;  %v145_v50 = vadd.f32 %v144_v42, %v46_v23  ;;  %v234_v51 = vadd.f32 %v233_v43, %v46_v23 }
  0xe1   :  { %v447_v48 = vpack.c.bf16 %v249_v40, %v245_v38  ;;  %v455_v49 = vpack.c.bf16 %v251_v41, %v247_v39  ;;  %v147_v53 = vadd.f32 %v146_v46, %v46_v23  ;;  %v236_v54 = vadd.f32 %v235_v47, %v46_v23 }
  0xe2   :  { %v252_v63 = vmax.f32 %v145_v50, 0.0  ;;  %v254_v0 = vmax.f32 %v234_v51, 0.0 }
  0xe3   :  { %v150_v55 = vpop.f32.mrb[6].mxu0  ;;  %v239_v56 = vpop.f32.mrb[6].mxu1  ;;  %448 = vmatprep.subr.bf16.mxu0 %v447_v48  ;;  %456 = vmatprep.subr.bf16.mxu1 %v455_v49  ;;  %v253_v3 = vmax.f32 %v147_v53, 0.0  ;;  %v255_v4 = vmax.f32 %v236_v54, 0.0 }
  0xe4   :  { %v151_v57 = vadd.f32 %v150_v55, %v51_v52  ;;  %v240_v58 = vadd.f32 %v239_v56, %v51_v52  ;;  %v152_v59 = vpop.f32.mrb[7].mxu0  ;;  %v241_v60 = vpop.f32.mrb[7].mxu1  ;;  %450 = vmatpush1.bf16.msra.mxu0 %v449_v44  ;;  %458 = vmatpush1.bf16.msra.mxu1 %v457_v45 }
  0xe5   :  { %v153_v61 = vadd.f32 %v152_v59, %v51_v52  ;;  %v242_v62 = vadd.f32 %v241_v60, %v51_v52 }
  0xe6   :  { %v256_v1 = vmax.f32 %v151_v57, 0.0  ;;  %v258_v2 = vmax.f32 %v240_v58, 0.0 }
  0xe7   :  { %v257_v5 = vmax.f32 %v153_v61, 0.0  ;;  %v259_v6 = vmax.f32 %v242_v62, 0.0 }
  0xe8   :  { %v453_v7 = vpack.c.bf16 %v256_v1, %v252_v63  ;;  %v461_v8 = vpack.c.bf16 %v258_v2, %v254_v0 }
  0xe9   :  { %v451_v9 = vpack.c.bf16 %v257_v5, %v253_v3  ;;  %v459_v10 = vpack.c.bf16 %v259_v6, %v255_v4 }
  0xeb   :  { %452 = vmatprep.subr.bf16.mxu0 %v451_v9  ;;  %460 = vmatprep.subr.bf16.mxu1 %v459_v10 }
  0xec   :  { %454 = vmatpush1.bf16.msra.mxu0 %v453_v7  ;;  %462 = vmatpush1.bf16.msra.mxu1 %v461_v8 }
  0xef   :  { %445 = vmatmul.mubr.msk.f32.vlgmr.msra.gmra.mrb[8].mxu0 %vm267_vm1, %v260_v11  ;;  %446 = vmatmul.mubr.msk.f32.vlgmr.msra.gmra.mrb[8].mxu1 %vm267_vm1, %v260_v11 }
 0x1c2   :  { %v337_v13 = vpop.f32.mrb[8].mxu0  ;;  %v408_v14 = vpop.f32.mrb[8].mxu1 }
 0x1c3   :  { %v338_v15 = vadd.f32 %v337_v13, %v265_v12  ;;  %v409_v16 = vadd.f32 %v408_v14, %v265_v12  ;;  %v339_v17 = vpop.f32.mrb[9].mxu0  ;;  %v410_v18 = vpop.f32.mrb[9].mxu1 }
 0x1c4   :  { %v340_v19 = vadd.f32 %v339_v17, %v265_v12  ;;  %v411_v20 = vadd.f32 %v410_v18, %v265_v12 }
 0x1c6   :  { %v417_v21 = vcombine.low %v338_v15, %v340_v19  ;;  %v418_v22 = vcombine.low %v409_v16, %v411_v20 }
 0x1c8   :  { %421 = vst [vmem:[#allocation2] sm:$0xff] %v417_v21  ;;  %422 = vst [vmem:[#allocation2 + $0x8] sm:$0xff] %v418_v22 }
 0x1c9   :  { %479 = shalt.err (!%p476_p4)
}
 0x1ca   :  { %s480_s21 = scalar_lea.hbm %s592_s5, 256 }
 0x1cb   :  { %p481_p5 = scmp.ne.s32.totalorder %s592_s5, %s480_s21  ;;  %p484_p6 = scmp.lt.u32.totalorder %s480_s21, %s592_s5 }
 0x1cd   :  { %p486_p7 = pnand %p484_p6, %p481_p5 }
 0x1cf   :  { %489 = shalt.err (!%p486_p7)
}
 0x1d0   :  { %432 = dma.vmem_to_hbm [thread:$0]  %s430_s18, 256, %s592_s5, [#allocation3]  }
 0x1d1   :  { %490 = dma.done.wait [#allocation3], 256  }
 0x1d2   :  { %491 = vsyncadd [#allocation3], 4294967040 }
 0x1d3   :  { %436 = vsyncpa [#allocation3], 1 }

</bundles_post_ra>
